<compile_context>
chip_gen: v6e
topology: v6e:2x2x1
jax: 0.10.0
libtpu: 0.0.40
codegen_flags: <defaults>
</compile_context>

<pallas_src>
import functools

import jax
import jax.numpy as jnp
from jax.experimental import pallas as pl
from jax.experimental.pallas import tpu as pltpu

INPUT_SIZE = 28 * 28     # 784
NUM_CLASSES = 10
N_PAD = 128              # lane-dense output width (multiple of 128)
DEFAULT_TILE_B = 512     # batch tile (multiple of 8); fits default VMEM on all gens


def _round_up(x, m):
    return ((x + m - 1) // m) * m


def _linear_kernel(x_ref, w_ref, b_ref, o_ref):
    # x_ref: (TILE_B, 784) bf16 ; w_ref: (784, 128) bf16 ; b_ref: (1, 128) f32
    # o_ref: (TILE_B, 128) f32
    acc = jnp.dot(x_ref[...], w_ref[...], preferred_element_type=jnp.float32)
    o_ref[...] = acc + b_ref[...]


def prepare_params(weight, bias, compute_dtype=jnp.bfloat16):
    """One-time parameter layout: transpose + pad N (10 -> 128) + cast to bf16.

    weight: (10, 784), bias: (10,)  -- nn.Linear conventions.
    Returns w_pad: (784, 128) compute_dtype, b_pad: (1, 128) float32.
    Padded columns are zero, so they contribute nothing and are sliced off later.
    """
    w_pad = jnp.zeros((INPUT_SIZE, N_PAD), compute_dtype)
    w_pad = w_pad.at[:, :NUM_CLASSES].set(weight.T.astype(compute_dtype))
    b_pad = jnp.zeros((1, N_PAD), jnp.float32)
    b_pad = b_pad.at[:, :NUM_CLASSES].set(bias.astype(jnp.float32))
    return w_pad, b_pad


@functools.partial(jax.jit, static_argnames=("tile_b",))
def mnist_model_forward(xb, w_pad, b_pad, *, tile_b=DEFAULT_TILE_B):
    """Forward matching MnistModel: xb.reshape(-1, 784) @ W.T + b -> (B, 10) f32 logits."""
    x2d = xb.reshape(-1, INPUT_SIZE)
    B = x2d.shape[0]
    compute_dtype = w_pad.dtype

    # Batch tiling: tile is a multiple of 8 (sublane); batch padded to multiple of tile.
    tile = min(tile_b, _round_up(B, 8))
    b_padded = _round_up(B, tile)

    x2d = x2d.astype(compute_dtype)
    if b_padded != B:
        x2d = jnp.pad(x2d, ((0, b_padded - B), (0, 0)))

    grid = (b_padded // tile,)
    x_bytes = b_padded * INPUT_SIZE * x2d.dtype.itemsize
    w_bytes = INPUT_SIZE * N_PAD * w_pad.dtype.itemsize
    o_bytes = b_padded * N_PAD * 4

    out = pl.pallas_call(
        _linear_kernel,
        out_shape=jax.ShapeDtypeStruct((b_padded, N_PAD), jnp.float32),
        grid_spec=pltpu.PrefetchScalarGridSpec(
            num_scalar_prefetch=0,
            grid=grid,
            in_specs=[
                pl.BlockSpec((tile, INPUT_SIZE), lambda i: (i, 0)),    # x: batch-tiled
                pl.BlockSpec((INPUT_SIZE, N_PAD), lambda i: (0, 0)),   # w: VMEM-resident
                pl.BlockSpec((1, N_PAD), lambda i: (0, 0)),            # b: VMEM-resident
            ],
            out_specs=pl.BlockSpec((tile, N_PAD), lambda i: (i, 0)),
        ),
        compiler_params=pltpu.CompilerParams(
            dimension_semantics=("parallel",),   # independent batch tiles -> megacore on v7x
        ),
        cost_estimate=pl.CostEstimate(
            flops=2 * b_padded * INPUT_SIZE * N_PAD,
            transcendentals=0,
            bytes_accessed=x_bytes + w_bytes + b_pad.size * 4 + o_bytes,
        ),
    )(x2d, w_pad, b_pad)

    # Strip batch padding and the lane padding (128 -> 10).
    return out[:B, :NUM_CLASSES]


if __name__ == "__main__":
    key = jax.random.PRNGKey(0)
    k_x, k_w, k_b = jax.random.split(key, 3)

    # PyTorch nn.Linear default init: U(-1/sqrt(in), 1/sqrt(in))
    bound = 1.0 / jnp.sqrt(jnp.float32(INPUT_SIZE))
    weight = jax.random.uniform(
        k_w, (NUM_CLASSES, INPUT_SIZE), jnp.float32, minval=-bound, maxval=bound
    )
    bias = jax.random.uniform(
        k_b, (NUM_CLASSES,), jnp.float32, minval=-bound, maxval=bound
    )

    # One-time parameter layout (transpose + pad + bf16 cast).
    w_pad, b_pad = prepare_params(weight, bias)

    # Small MNIST-like batch, NCHW: (batch=2, channels=1, 28, 28)
    xb = jax.random.normal(k_x, (2, 1, 28, 28), dtype=jnp.float32)

    out = mnist_model_forward(xb, w_pad, b_pad)
    jax.block_until_ready(out)

    # Reference with matched bf16 rounding of x/W and f32 accumulation.
    x2d = xb.reshape(-1, INPUT_SIZE)
    ref = (
        x2d.astype(jnp.bfloat16).astype(jnp.float32)
        @ weight.T.astype(jnp.bfloat16).astype(jnp.float32)
    ) + bias

    assert out.shape == (2, NUM_CLASSES)
    assert out.dtype == jnp.float32
    assert jnp.allclose(out, ref, atol=1e-2, rtol=1e-2)

    print("KERNEL_OK")
</pallas_src>

<mosaic_0001>
module attributes {stable_mosaic.version = 11 : i64} {
  func.func @_linear_kernel(%arg0: i32, %arg1: memref<8x784xbf16, #tpu.memory_space<vmem>>, %arg2: memref<784x128xbf16, #tpu.memory_space<vmem>>, %arg3: memref<1x128xf32, #tpu.memory_space<vmem>>, %arg4: memref<8x128xf32, #tpu.memory_space<vmem>>) attributes {dimension_semantics = [#tpu.dimension_semantics<parallel>], iteration_bounds = array<i64: 1>, scalar_prefetch = 0 : i64, scratch_operands = 0 : i64, tpu.core_type = #tpu.core_type<tc>, window_params = [{transform_indices = @transform_0, window_bounds = array<i64: 8, 784>}, {pipeline_mode = #tpu.pipeline_mode<synchronous>, transform_indices = @transform_1, window_bounds = array<i64: 784, 128>}, {pipeline_mode = #tpu.pipeline_mode<synchronous>, transform_indices = @transform_2, window_bounds = array<i64: 1, 128>}, {transform_indices = @transform_3, window_bounds = array<i64: 8, 128>}]} {
    %c0 = arith.constant 0 : index
    %c0_0 = arith.constant 0 : index
    %0 = vector.load %arg1[%c0, %c0_0] : memref<8x784xbf16, #tpu.memory_space<vmem>>, vector<8x784xbf16>
    %c0_1 = arith.constant 0 : index
    %c0_2 = arith.constant 0 : index
    %1 = vector.load %arg2[%c0_1, %c0_2] : memref<784x128xbf16, #tpu.memory_space<vmem>>, vector<784x128xbf16>
    %cst = arith.constant dense<0.000000e+00> : vector<8x128xf32>
    %2 = tpu.matmul %0, %1, %cst {dimension_numbers = #tpu.dot_dimension_numbers<[1], [0], [0], [1], [0, 0, 1, 1], [], []>} : vector<8x784xbf16>, vector<784x128xbf16>, vector<8x128xf32> -> vector<8x128xf32>
    %c0_3 = arith.constant 0 : index
    %c0_4 = arith.constant 0 : index
    %3 = vector.load %arg3[%c0_3, %c0_4] : memref<1x128xf32, #tpu.memory_space<vmem>>, vector<1x128xf32>
    %4 = vector.broadcast %3 : vector<1x128xf32> to vector<8x128xf32>
    %5 = arith.addf %2, %4 : vector<8x128xf32>
    %c0_5 = arith.constant 0 : index
    %c0_6 = arith.constant 0 : index
    %6 = vector.load %arg4[%c0_5, %c0_6] : memref<8x128xf32, #tpu.memory_space<vmem>>, vector<8x128xf32>
    tpu.vector_store %arg4[%c0_5, %c0_6], %5 {strides = array<i32>} : memref<8x128xf32, #tpu.memory_space<vmem>>, vector<8x128xf32>,
    return
  }
  func.func @transform_0(%arg0: i32) -> (i32, i32) {
    %c0_i32 = arith.constant 0 : i32
    %c0_i32_0 = arith.constant 0 : i32
    return %arg0, %c0_i32 : i32, i32
  }
  func.func @transform_1(%arg0: i32) -> (i32, i32) {
    %c0_i32 = arith.constant 0 : i32
    %c0_i32_0 = arith.constant 0 : i32
    %c0_i32_1 = arith.constant 0 : i32
    return %c0_i32, %c0_i32_0 : i32, i32
  }
  func.func @transform_2(%arg0: i32) -> (i32, i32) {
    %c0_i32 = arith.constant 0 : i32
    %c0_i32_0 = arith.constant 0 : i32
    %c0_i32_1 = arith.constant 0 : i32
    return %c0_i32, %c0_i32_0 : i32, i32
  }
  func.func @transform_3(%arg0: i32) -> (i32, i32) {
    %c0_i32 = arith.constant 0 : i32
    %c0_i32_0 = arith.constant 0 : i32
    return %arg0, %c0_i32 : i32, i32
  }
}

</mosaic_0001>

<bundles_post_ra>
// kernel: mnist_model_forward.1
= control target key start
LH: loop header
LB: loop body
LE: loop exit
PB: predicated region body
PF: predicated region fallthrough
CT: control target
= control target key end

     0   :  { %8 = vsyncpa [#allocation3], 0  ;;  %s841_s12 = smov [#allocation2]   ;;  %s887_s0 = inlined_call_operand.vmem [shape: bf16[8,784], index: 0, kind: input, shape index: {}]   ;;  %s888_s1 = inlined_call_operand.hbm [shape: bf16[784,128], index: 1, kind: input, shape index: {}]   ;;  %s889_s2 = inlined_call_operand.vmem [shape: f32[1,128], index: 2, kind: input, shape index: {}]   ;;  %s890_s3 = inlined_call_operand.vmem [shape: f32[8,128], index: 3, kind: output, shape index: {}]  }
   0x1   :  { %s16_s13 = sshll.u32 %s841_s12, 4  ;;  %s17_s13 = int_to_ptr.vmem [resolvable:$true] %s16_s13 }
   0x2   :  { %s827_s14 = scalar_lea.vmem %s17_s13, 6272  ;;  %p832_p1 = scmp.lt.s32.totalorder %s17_s13, %s17_s13 }
   0x3   :  { %p828_p0 = scmp.ne.s32.totalorder %s17_s13, %s827_s14  ;;  %p833_p2 = scmp.lt.s32.totalorder %s827_s14, %s827_s14 }
   0x5   :  { %p834_p3 = por %p833_p2, %p832_p1 }
   0x7   :  { %p835_p4 = pnand %p834_p3, %p828_p0 }
   0x9   :  { %838 = shalt.err (!%p835_p4)
}
   0xa   :  { %s842_s15 = smov 64   ;;  %s843_s16 = smov 4  }
   0xb   :  { %22 = dma.hbm_to_vmem [thread:$0]  %s888_s1, 6272, %s17_s13, [#allocation3], %s842_s15, %s842_s15, %s843_s16  }
   0xc   :  { %839 = dma.done.wait [#allocation3], 6272  }
   0xd   :  { %840 = vsyncadd [#allocation3], 4294961024  ;;  %v763_v0 = vld [vmem:[#allocation2 + $0x78] sm:$0xff]   ;;  %v767_v4 = vld [vmem:[#allocation2 + $0x70] sm:$0xff]   ;;  %v844_v43 = vmov 0.0   ;;  %vm845_vm0 = vmmov 0  }
   0xe   :  { %v764_v1 = vld [vmem:[#allocation2 + $0x38] sm:$0xff]   ;;  %684 = vmatprep.subr.bf16.mxu0 %v763_v0  ;;  %v768_v5 = vld [vmem:[#allocation2 + $0x30] sm:$0xff]   ;;  %v771_v8 = vld [vmem:[#allocation2 + $0x68] sm:$0xff]   ;;  %vm456_vm1 = vcmask 130048  }
   0xf   :  { %v765_v2 = vld [vmem:[#allocation2 + $0xf8] sm:$0xff]   ;;  %685 = vmatpush3.bf16.msra.mxu0 %v764_v1  ;;  %v769_v6 = vld [vmem:[#allocation2 + $0xf0] sm:$0xff]   ;;  %v772_v9 = vld [vmem:[#allocation2 + $0x28] sm:$0xff]  }
  0x10   :  { %v766_v3 = vld [vmem:[#allocation2 + $0xb8] sm:$0xff]   ;;  %706 = vmatprep.subr.bf16.mxu1 %v765_v2  ;;  %686 = vmatprep.subr.bf16.mxu0 %v767_v4  ;;  %v770_v7 = vld [vmem:[#allocation2 + $0xb0] sm:$0xff]   ;;  %v773_v10 = vld [vmem:[#allocation2 + $0xe8] sm:$0xff]  }
  0x11   :  { %707 = vmatpush3.bf16.msra.mxu1 %v766_v3  ;;  %v774_v11 = vld [vmem:[#allocation2 + $0xa8] sm:$0xff]   ;;  %v775_v12 = vld [vmem:[#allocation2 + $0x60] sm:$0xff]   ;;  %v779_v16 = vld [vmem:[#allocation2 + $0x58] sm:$0xff]  }
  0x12   :  { %708 = vmatprep.subr.bf16.mxu1 %v769_v6  ;;  %v776_v13 = vld [vmem:[#allocation2 + $0x20] sm:$0xff]   ;;  %v780_v17 = vld [vmem:[#allocation2 + $0x18] sm:$0xff]   ;;  %v783_v20 = vld [vmem:[#allocation2 + $0x50] sm:$0xff]  }
  0x13   :  { %687 = vmatpush3.bf16.msra.mxu0 %v768_v5  ;;  %v777_v14 = vld [vmem:[#allocation2 + $0xe0] sm:$0xff]   ;;  %v781_v18 = vld [vmem:[#allocation2 + $0xd8] sm:$0xff]   ;;  %v784_v21 = vld [vmem:[#allocation2 + $0x10] sm:$0xff]  }
  0x14   :  { %688 = vmatprep.subr.bf16.mxu0 %v771_v8  ;;  %v778_v15 = vld [vmem:[#allocation2 + $0xa0] sm:$0xff]   ;;  %v782_v19 = vld [vmem:[#allocation2 + $0x98] sm:$0xff]   ;;  %v785_v22 = vld [vmem:[#allocation2 + $0xd0] sm:$0xff]  }
  0x15   :  { %709 = vmatpush3.bf16.msra.mxu1 %v770_v7  ;;  %v786_v23 = vld [vmem:[#allocation2 + $0x90] sm:$0xff]   ;;  %v787_v24 = vld [vmem:[#allocation2 + $0x48] sm:$0xff]   ;;  %v791_v28 = vld [vmem:[#allocation2 + $0x40] sm:$0xff]  }
  0x16   :  { %710 = vmatprep.subr.bf16.mxu1 %v773_v10  ;;  %v788_v25 = vld [vmem:[#allocation2 + $0x8] sm:$0xff]   ;;  %v792_v29 = vld [vmem:[#allocation2] sm:$0xff]   ;;  %v797_v35 = vld [vmem:[#allocation2 + $0x178] sm:$0xff]  }
  0x17   :  { %689 = vmatpush3.bf16.msra.mxu0 %v772_v9  ;;  %v789_v26 = vld [vmem:[#allocation2 + $0xc8] sm:$0xff]   ;;  %v793_v30 = vld [vmem:[#allocation2 + $0xc0] sm:$0xff]   ;;  %v800_v39 = vld [vmem:[#allocation2 + $0x138] sm:$0xff]  }
  0x18   :  { %690 = vmatprep.subr.bf16.mxu0 %v775_v12  ;;  %v790_v27 = vld [vmem:[#allocation2 + $0x88] sm:$0xff]   ;;  %v29_v31 = vld [vmem:[%s887_s0] sm:$0xff]  ;;  %v801_v40 = vld [vmem:[#allocation2 + $0x170] sm:$0xff]  }
  0x19   :  { %711 = vmatpush3.bf16.msra.mxu1 %v774_v11  ;;  %v627_v32 = vcombine.low %v29_v31, %v29_v31  ;;  %v628_v33 = vcombine.high %v29_v31, %v29_v31  ;;  %v796_v34 = vld [vmem:[#allocation2 + $0x80] sm:$0xff]   ;;  %v30_v36 = vld [vmem:[%s887_s0 + $0x8] sm:$0xff]  ;;  %v802_v41 = vld [vmem:[#allocation2 + $0x130] sm:$0xff]  }
  0x1a   :  { %712 = vmatprep.subr.bf16.mxu1 %v777_v14  ;;  %v629_v37 = vcombine.low %v30_v36, %v30_v36  ;;  %v630_v38 = vcombine.high %v30_v36, %v30_v36  ;;  %v803_v42 = vld [vmem:[#allocation2 + $0x168] sm:$0xff]   ;;  %v805_v45 = vld [vmem:[#allocation2 + $0x160] sm:$0xff]   ;;  %v807_v47 = vld [vmem:[#allocation2 + $0x158] sm:$0xff]  }
  0x1b   :  { %691 = vmatpush3.bf16.msra.mxu0 %v776_v13  ;;  %492 = vmatprep.mubr.bf16.mxu0 %v628_v33  ;;  %v804_v44 = vld [vmem:[#allocation2 + $0x128] sm:$0xff]   ;;  %v806_v46 = vld [vmem:[#allocation2 + $0x120] sm:$0xff]   ;;  %v808_v49 = vld [vmem:[#allocation2 + $0x118] sm:$0xff]  }
  0x1c   :  { %692 = vmatprep.subr.bf16.mxu0 %v779_v16  ;;  %532 = vmatprep.mubr.bf16.mxu1 %v630_v38  ;;  %v813_v48 = vld [vmem:[#allocation2 + $0x180] sm:$0xff]   ;;  %v809_v50 = vld [vmem:[#allocation2 + $0x150] sm:$0xff]   ;;  %v816_v51 = vld [vmem:[%s887_s0 + $0x18] ss:$0 sps:$4 sm:$0xff]  }
  0x1d   :  { %713 = vmatpush3.bf16.msra.mxu1 %v778_v15  ;;  %v31_v52 = vld [vmem:[%s887_s0 + $0x10] sm:$0xff]  ;;  %v811_v55 = vld [vmem:[#allocation2 + $0x148] sm:$0xff]   ;;  %v814_v57 = vld [vmem:[#allocation2 + $0x140] sm:$0xff]  }
  0x1e   :  { %714 = vmatprep.subr.bf16.mxu1 %v781_v18  ;;  %v632_v53 = vcombine.high %v31_v52, %v31_v52  ;;  %v810_v54 = vld [vmem:[#allocation2 + $0x110] sm:$0xff]   ;;  %v812_v56 = vld [vmem:[#allocation2 + $0x108] sm:$0xff]   ;;  %v815_v58 = vld [vmem:[#allocation2 + $0x100] sm:$0xff]   ;;  %v631_v59 = vcombine.low %v31_v52, %v31_v52 }
  0x1f   :  { %693 = vmatpush3.bf16.msra.mxu0 %v780_v17  ;;  %v626_v9 = vld [vmem:[%s889_s2] ss:$0 sm:$0xff] }
  0x20   :  { %694 = vmatprep.subr.bf16.mxu0 %v783_v20 }
  0x21   :  { %715 = vmatpush3.bf16.msra.mxu1 %v782_v19 }
  0x22   :  { %716 = vmatprep.subr.bf16.mxu1 %v785_v22 }
  0x23   :  { %695 = vmatpush3.bf16.msra.mxu0 %v784_v21 }
  0x24   :  { %696 = vmatprep.subr.bf16.mxu0 %v787_v24 }
  0x25   :  { %717 = vmatpush3.bf16.msra.mxu1 %v786_v23 }
  0x26   :  { %718 = vmatprep.subr.bf16.mxu1 %v789_v26 }
  0x27   :  { %697 = vmatpush3.bf16.msra.mxu0 %v788_v25 }
  0x28   :  { %698 = vmatprep.subr.bf16.mxu0 %v791_v28 }
  0x29   :  { %719 = vmatpush3.bf16.msra.mxu1 %v790_v27 }
  0x2a   :  { %720 = vmatprep.subr.bf16.mxu1 %v793_v30 }
  0x2b   :  { %699 = vmatpush3.bf16.msra.mxu0 %v792_v29 }
  0x2c   :  { %728 = vmatprep.subr.bf16.mxu0 %v797_v35 }
  0x2d   :  { %721 = vmatpush3.bf16.msra.mxu1 %v796_v34 }
  0x2e   :  { %493 = vmatmul.mubr.bf16.vlgmr.msra.gmra.mxu0 %v627_v32  ;;  %752 = vmatprep.subr.bf16.mxu1 %v844_v43 }
  0x2f   :  { %729 = vmatpush3.bf16.msra.mxu0 %v800_v39  ;;  %572 = vmatprep.mubr.bf16.mxu0 %v632_v53 }
  0x30   :  { %533 = vmatmul.mubr.bf16.vlgmr.msra.gmra.mxu1 %v629_v37  ;;  %730 = vmatprep.subr.bf16.mxu0 %v801_v40 }
  0x31   :  { %754 = vmatprep.mubr.msk.bf16.mxu1 %vm845_vm0, %v844_v43  ;;  %753 = vmatpush3.bf16.msra.mxu1 %v813_v48 }
  0x33   :  { %731 = vmatpush3.bf16.msra.mxu0 %v802_v41 }
  0x34   :  { %732 = vmatprep.subr.bf16.mxu0 %v803_v42 }
  0x37   :  { %733 = vmatpush3.bf16.msra.mxu0 %v804_v44 }
  0x38   :  { %734 = vmatprep.subr.bf16.mxu0 %v805_v45  ;;  %755 = vmatmul.mubr.msk.bf16.vlgmr.msra.gmra.mxu1 %vm456_vm1, %v816_v51 }
  0x3b   :  { %735 = vmatpush3.bf16.msra.mxu0 %v806_v46 }
  0x3c   :  { %736 = vmatprep.subr.bf16.mxu0 %v807_v47 }
  0x3f   :  { %737 = vmatpush3.bf16.msra.mxu0 %v808_v49 }
  0x40   :  { %738 = vmatprep.subr.bf16.mxu0 %v809_v50 }
  0x43   :  { %739 = vmatpush3.bf16.msra.mxu0 %v810_v54 }
  0x44   :  { %740 = vmatprep.subr.bf16.mxu0 %v811_v55 }
  0x47   :  { %741 = vmatpush3.bf16.msra.mxu0 %v812_v56 }
  0x48   :  { %742 = vmatprep.subr.bf16.mxu0 %v814_v57 }
  0x4b   :  { %743 = vmatpush3.bf16.msra.mxu0 %v815_v58 }
  0x4e   :  { %573 = vmatmul.mubr.bf16.vlgmr.msra.gmra.mxu0 %v631_v59 }
  0xee   :  { %v700_v60 = vpop.f32.mrf.mxu0 }
  0xf0   :  { %v701_v61 = vpop.f32.mrf.mxu0  ;;  %v722_v62 = vpop.f32.mrf.mxu1 }
  0xf1   :  { %v702_v8 = vadd.f32 %v701_v61, %v700_v60 }
  0xf2   :  { %v703_v63 = vpop.f32.mrf.mxu0  ;;  %v723_v0 = vpop.f32.mrf.mxu1 }
  0xf3   :  { %v495_v10 = vadd.f32 %v702_v8, %v626_v9  ;;  %v724_v11 = vadd.f32 %v723_v0, %v722_v62 }
  0xf4   :  { %v704_v1 = vpop.f32.mrf.mxu0  ;;  %v725_v2 = vpop.f32.mrf.mxu1 }
  0xf5   :  { %v535_v14 = vadd.f32 %v724_v11, %v495_v10 }
  0xf6   :  { %v726_v3 = vpop.f32.mrf.mxu1 }
  0xf8   :  { %v614_v4 = vpop.f32.mrf.mxu1 }
  0xfa   :  { %v756_v5 = vpop.f32.mrf.mxu1 }
  0xfc   :  { %v617_v6 = vpop.f32.mrf.mxu1 }
  0xfe   :  { %v757_v7 = vpop.f32.mrf.mxu1 }
 0x10e   :  { %v744_v12 = vpop.f32.mrf.mxu0 }
 0x110   :  { %v745_v13 = vpop.f32.mrf.mxu0 }
 0x111   :  { %v746_v15 = vadd.f32 %v745_v13, %v744_v12 }
 0x112   :  { %v747_v16 = vpop.f32.mrf.mxu0 }
 0x113   :  { %v575_v17 = vadd.f32 %v746_v15, %v535_v14 }
 0x114   :  { %v748_v18 = vpop.f32.mrf.mxu0 }
 0x115   :  { %v615_v19 = vadd.f32 %v614_v4, %v575_v17 }
 0x117   :  { %620 = vst [vmem:[%s890_s3] sm:$0xff] %v615_v19 }
 0x118   :  { %625 = vsyncpa [#allocation3], 1 }

</bundles_post_ra>
